<compile_context>
chip_gen: v7x
topology: tpu7x:2x2x1
jax: 0.10.0
libtpu: 0.0.40
codegen_flags: <defaults>
</compile_context>

<pallas_src>
import functools

import jax
import jax.numpy as jnp
from jax.experimental import pallas as pl
from jax.experimental.pallas import tpu as pltpu

LANE = 128
SUBLANE = 8


def _round_up(n, m):
    return ((n + m - 1) // m) * m


def dqn_kernel(x_ref, w1_ref, b1_ref, w2_ref, b2_ref, w3_ref, b3_ref, o_ref):
    # Layer 1: Linear(state_dim, 256) + ReLU. bf16 matmul on the MXU, f32 accumulate.
    # x arrives as f32; cast in-kernel (VALU slots have slack under the MXU loop).
    x = x_ref[...].astype(jnp.bfloat16)
    h1 = jnp.dot(x, w1_ref[...], preferred_element_type=jnp.float32)
    h1 = jnp.maximum(h1 + b1_ref[...], 0.0)                       # f32 epilogue (v5e-safe)

    # Layer 2: Linear(256, 256) + ReLU.
    h2 = jnp.dot(h1.astype(jnp.bfloat16), w2_ref[...],
                 preferred_element_type=jnp.float32)
    h2 = jnp.maximum(h2 + b2_ref[...], 0.0)

    # Layer 3: Linear(256, action_dim). w3 is lane-padded to 128 once at init so
    # the MXU tile stays dense; slice back to the true action_dim in-registers so
    # the HBM store is only the real Q-values (narrow masked vst, not a 512B/row
    # padded f32 slab).
    out = jnp.dot(h2.astype(jnp.bfloat16), w3_ref[...],
                  preferred_element_type=jnp.float32)
    a = o_ref.shape[-1]
    # NOTE: bf16 matmuls are a deliberate precision tradeoff; if exact argmax
    # parity with the f32 PyTorch net is required, keep w3 in f32 (it is cheap).
    o_ref[...] = (out[:, :a] + b3_ref[...]).astype(o_ref.dtype)


def prepare_params(params):
    """One-time preprocessing (do NOT call per forward): cast weights to bf16,
    lane-pad w3 to a 128-wide slab, and keep biases in f32 with shape (1, out)."""
    w1 = params["w1"].astype(jnp.bfloat16)
    w2 = params["w2"].astype(jnp.bfloat16)
    w3 = params["w3"]
    H, A = w3.shape
    A_pad = _round_up(max(A, LANE), LANE)
    w3p = jnp.zeros((H, A_pad), jnp.bfloat16).at[:, :A].set(w3.astype(jnp.bfloat16))
    return {
        "w1": w1,
        "b1": params["b1"].reshape(1, -1).astype(jnp.float32),
        "w2": w2,
        "b2": params["b2"].reshape(1, -1).astype(jnp.float32),
        "w3": w3p,
        "b3": params["b3"].reshape(1, -1).astype(jnp.float32),
    }


@functools.partial(jax.jit, static_argnames=("tile_b",))
def dqnetwork_forward(x, prepped, *, tile_b=None):
    """x: (B, state_dim) float32. prepped: output of prepare_params.
    Returns (B, action_dim) float32 Q-values."""
    w1, b1 = prepped["w1"], prepped["b1"]
    w2, b2 = prepped["w2"], prepped["b2"]
    w3, b3 = prepped["w3"], prepped["b3"]

    B, S = x.shape
    H = w1.shape[1]
    A = b3.shape[1]          # true action_dim (w3 is lane-padded)

    # Batch tiling: at least 2 grid steps when the batch allows it (v7x 2-TC
    # sharding on the "parallel" axis), cap the tile at 512 rows.
    if tile_b is None:
        tile_b = min(512, _round_up(max(pl.cdiv(B, 2), SUBLANE), SUBLANE))
    else:
        tile_b = _round_up(max(tile_b, SUBLANE), SUBLANE)
    grid = (pl.cdiv(B, tile_b),)

    # Weights / biases: constant index_map -> DMA'd once, VMEM-resident across tiles.
    const2d = lambda a: pl.BlockSpec(a.shape, lambda i: (0, 0))

    cost = pl.CostEstimate(
        flops=2 * B * (S * H + H * H + H * w3.shape[1]),
        transcendentals=0,
        bytes_accessed=(x.size * 4
                        + (w1.size + w2.size + w3.size) * 2
                        + (b1.size + b2.size + b3.size) * 4
                        + B * A * 4),
    )

    extra_cp = {}
    if tile_b > 512:
        # v5e scoped-VMEM default is 16 MiB; leave headroom for big tiles.
        extra_cp["vmem_limit_bytes"] = 64 * 1024 * 1024

    return pl.pallas_call(
        dqn_kernel,
        out_shape=jax.ShapeDtypeStruct((B, A), jnp.float32),
        grid_spec=pltpu.PrefetchScalarGridSpec(
            num_scalar_prefetch=0,
            grid=grid,
            in_specs=[
                pl.BlockSpec((tile_b, S), lambda i: (i, 0)),   # x: streamed per tile
                const2d(w1), const2d(b1),
                const2d(w2), const2d(b2),
                const2d(w3), const2d(b3),
            ],
            out_specs=pl.BlockSpec((tile_b, A), lambda i: (i, 0)),
        ),
        compiler_params=pltpu.CompilerParams(
            dimension_semantics=("parallel",), **extra_cp),
        cost_estimate=cost,
    )(x, w1, b1, w2, b2, w3, b3)


def init_params(key, state_dim, action_dim, hidden=256):
    """Deterministic synthetic init mirroring the PyTorch layer shapes.
    PyTorch Linear stores weight as (out, in); we keep it transposed (in, out)."""
    ks = jax.random.split(key, 6)

    def lin(kw, kb, fan_in, fan_out):
        bound = 1.0 / jnp.sqrt(fan_in)
        w = jax.random.uniform(kw, (fan_in, fan_out), jnp.float32, -bound, bound)
        b = jax.random.uniform(kb, (1, fan_out), jnp.float32, -bound, bound)
        return w, b

    w1, b1 = lin(ks[0], ks[1], state_dim, hidden)
    w2, b2 = lin(ks[2], ks[3], hidden, hidden)
    w3, b3 = lin(ks[4], ks[5], hidden, action_dim)
    return {"w1": w1, "b1": b1, "w2": w2, "b2": b2, "w3": w3, "b3": b3}


def _ref_bf16(x, params):
    """Matched-precision reference (bf16 matmuls, f32 accumulation) in plain JAX."""
    xb = x.astype(jnp.bfloat16)
    w1b = params["w1"].astype(jnp.bfloat16)
    w2b = params["w2"].astype(jnp.bfloat16)
    w3b = params["w3"].astype(jnp.bfloat16)
    h1 = jnp.maximum(
        jnp.dot(xb, w1b, preferred_element_type=jnp.float32) + params["b1"], 0.0)
    h2 = jnp.maximum(
        jnp.dot(h1.astype(jnp.bfloat16), w2b, preferred_element_type=jnp.float32)
        + params["b2"], 0.0)
    return (jnp.dot(h2.astype(jnp.bfloat16), w3b,
                    preferred_element_type=jnp.float32) + params["b3"])


if __name__ == "__main__":
    key = jax.random.PRNGKey(0)
    k_x, k_x2, k_p = jax.random.split(key, 3)

    batch, state_dim, action_dim = 8, 32, 8
    x = jax.random.normal(k_x, (batch, state_dim), jnp.float32)
    params = init_params(k_p, state_dim, action_dim)
    prepped = prepare_params(params)          # one-time; not in the forward path

    out = dqnetwork_forward(x, prepped)
    out = jax.block_until_ready(out)
    assert out.shape == (batch, action_dim)

    ref_bf16 = _ref_bf16(x, params)
    assert jnp.allclose(out, ref_bf16, atol=2e-3, rtol=2e-3), \
        float(jnp.max(jnp.abs(out - ref_bf16)))

    # Full-f32 PyTorch-equivalent forward (looser tolerance for bf16 matmuls).
    h1f = jnp.maximum(x @ params["w1"] + params["b1"], 0.0)
    h2f = jnp.maximum(h1f @ params["w2"] + params["b2"], 0.0)
    ref_f32 = h2f @ params["w3"] + params["b3"]
    assert jnp.allclose(out, ref_f32, atol=5e-2, rtol=5e-2), \
        float(jnp.max(jnp.abs(out - ref_f32)))

    # Exercise the non-divisible batch path (partial final block, masked store).
    batch2 = 10
    x2 = jax.random.normal(k_x2, (batch2, state_dim), jnp.float32)
    out2 = jax.block_until_ready(dqnetwork_forward(x2, prepped, tile_b=8))
    assert out2.shape == (batch2, action_dim)
    ref2 = _ref_bf16(x2, params)
    assert jnp.allclose(out2, ref2, atol=2e-3, rtol=2e-3), \
        float(jnp.max(jnp.abs(out2 - ref2)))

    print("KERNEL_OK")
</pallas_src>

<mosaic_0001>
module attributes {stable_mosaic.version = 11 : i64} {
  func.func @dqn_kernel(%arg0: i32, %arg1: memref<8x32xf32, #tpu.memory_space<vmem>>, %arg2: memref<32x256xbf16, #tpu.memory_space<vmem>>, %arg3: memref<1x256xf32, #tpu.memory_space<vmem>>, %arg4: memref<256x256xbf16, #tpu.memory_space<vmem>>, %arg5: memref<1x256xf32, #tpu.memory_space<vmem>>, %arg6: memref<256x128xbf16, #tpu.memory_space<vmem>>, %arg7: memref<1x8xf32, #tpu.memory_space<vmem>>, %arg8: memref<8x8xf32, #tpu.memory_space<vmem>>) attributes {dimension_semantics = [#tpu.dimension_semantics<parallel>], iteration_bounds = array<i64: 1>, scalar_prefetch = 0 : i64, scratch_operands = 0 : i64, tpu.core_type = #tpu.core_type<tc>, window_params = [{transform_indices = @transform_0, window_bounds = array<i64: 8, 32>}, {pipeline_mode = #tpu.pipeline_mode<synchronous>, transform_indices = @transform_1, window_bounds = array<i64: 32, 256>}, {pipeline_mode = #tpu.pipeline_mode<synchronous>, transform_indices = @transform_2, window_bounds = array<i64: 1, 256>}, {pipeline_mode = #tpu.pipeline_mode<synchronous>, transform_indices = @transform_3, window_bounds = array<i64: 256, 256>}, {pipeline_mode = #tpu.pipeline_mode<synchronous>, transform_indices = @transform_4, window_bounds = array<i64: 1, 256>}, {pipeline_mode = #tpu.pipeline_mode<synchronous>, transform_indices = @transform_5, window_bounds = array<i64: 256, 128>}, {pipeline_mode = #tpu.pipeline_mode<synchronous>, transform_indices = @transform_6, window_bounds = array<i64: 1, 8>}, {transform_indices = @transform_7, window_bounds = array<i64: 8, 8>}]} {
    %c0 = arith.constant 0 : index
    %c0_0 = arith.constant 0 : index
    %0 = vector.load %arg1[%c0, %c0_0] : memref<8x32xf32, #tpu.memory_space<vmem>>, vector<8x32xf32>
    %1 = arith.truncf %0 : vector<8x32xf32> to vector<8x32xbf16>
    %c0_1 = arith.constant 0 : index
    %c0_2 = arith.constant 0 : index
    %2 = vector.load %arg2[%c0_1, %c0_2] : memref<32x256xbf16, #tpu.memory_space<vmem>>, vector<32x256xbf16>
    %cst = arith.constant dense<0.000000e+00> : vector<8x256xf32>
    %3 = tpu.matmul %1, %2, %cst {dimension_numbers = #tpu.dot_dimension_numbers<[1], [0], [0], [1], [0, 0, 1, 1], [], []>} : vector<8x32xbf16>, vector<32x256xbf16>, vector<8x256xf32> -> vector<8x256xf32>
    %c0_3 = arith.constant 0 : index
    %c0_4 = arith.constant 0 : index
    %4 = vector.load %arg3[%c0_3, %c0_4] : memref<1x256xf32, #tpu.memory_space<vmem>>, vector<1x256xf32>
    %5 = vector.broadcast %4 : vector<1x256xf32> to vector<8x256xf32>
    %6 = arith.addf %3, %5 : vector<8x256xf32>
    %cst_5 = arith.constant 0.000000e+00 : f32
    %7 = vector.broadcast %cst_5 : f32 to vector<8x256xf32>
    %8 = arith.maximumf %6, %7 : vector<8x256xf32>
    %9 = arith.truncf %8 : vector<8x256xf32> to vector<8x256xbf16>
    %c0_6 = arith.constant 0 : index
    %c0_7 = arith.constant 0 : index
    %10 = vector.load %arg4[%c0_6, %c0_7] : memref<256x256xbf16, #tpu.memory_space<vmem>>, vector<256x256xbf16>
    %cst_8 = arith.constant dense<0.000000e+00> : vector<8x256xf32>
    %11 = tpu.matmul %9, %10, %cst_8 {dimension_numbers = #tpu.dot_dimension_numbers<[1], [0], [0], [1], [0, 0, 1, 1], [], []>} : vector<8x256xbf16>, vector<256x256xbf16>, vector<8x256xf32> -> vector<8x256xf32>
    %c0_9 = arith.constant 0 : index
    %c0_10 = arith.constant 0 : index
    %12 = vector.load %arg5[%c0_9, %c0_10] : memref<1x256xf32, #tpu.memory_space<vmem>>, vector<1x256xf32>
    %13 = vector.broadcast %12 : vector<1x256xf32> to vector<8x256xf32>
    %14 = arith.addf %11, %13 : vector<8x256xf32>
    %cst_11 = arith.constant 0.000000e+00 : f32
    %15 = vector.broadcast %cst_11 : f32 to vector<8x256xf32>
    %16 = arith.maximumf %14, %15 : vector<8x256xf32>
    %17 = arith.truncf %16 : vector<8x256xf32> to vector<8x256xbf16>
    %c0_12 = arith.constant 0 : index
    %c0_13 = arith.constant 0 : index
    %18 = vector.load %arg6[%c0_12, %c0_13] : memref<256x128xbf16, #tpu.memory_space<vmem>>, vector<256x128xbf16>
    %cst_14 = arith.constant dense<0.000000e+00> : vector<8x128xf32>
    %19 = tpu.matmul %17, %18, %cst_14 {dimension_numbers = #tpu.dot_dimension_numbers<[1], [0], [0], [1], [0, 0, 1, 1], [], []>} : vector<8x256xbf16>, vector<256x128xbf16>, vector<8x128xf32> -> vector<8x128xf32>
    %20 = vector.extract_strided_slice %19 {offsets = [0, 0], sizes = [8, 8], strides = [1, 1]} : vector<8x128xf32> to vector<8x8xf32>
    %c0_15 = arith.constant 0 : index
    %c0_16 = arith.constant 0 : index
    %21 = vector.load %arg7[%c0_15, %c0_16] : memref<1x8xf32, #tpu.memory_space<vmem>>, vector<1x8xf32>
    %22 = vector.broadcast %21 : vector<1x8xf32> to vector<8x8xf32>
    %23 = arith.addf %20, %22 : vector<8x8xf32>
    %c0_17 = arith.constant 0 : index
    %c0_18 = arith.constant 0 : index
    %24 = vector.load %arg8[%c0_17, %c0_18] : memref<8x8xf32, #tpu.memory_space<vmem>>, vector<8x8xf32>
    tpu.vector_store %arg8[%c0_17, %c0_18], %23 {strides = array<i32>} : memref<8x8xf32, #tpu.memory_space<vmem>>, vector<8x8xf32>,
    return
  }
  func.func @transform_0(%arg0: i32) -> (i32, i32) {
    %c0_i32 = arith.constant 0 : i32
    %c0_i32_0 = arith.constant 0 : i32
    return %arg0, %c0_i32 : i32, i32
  }
  func.func @transform_1(%arg0: i32) -> (i32, i32) {
    %c0_i32 = arith.constant 0 : i32
    %c0_i32_0 = arith.constant 0 : i32
    %c0_i32_1 = arith.constant 0 : i32
    return %c0_i32, %c0_i32_0 : i32, i32
  }
  func.func @transform_2(%arg0: i32) -> (i32, i32) {
    %c0_i32 = arith.constant 0 : i32
    %c0_i32_0 = arith.constant 0 : i32
    %c0_i32_1 = arith.constant 0 : i32
    return %c0_i32, %c0_i32_0 : i32, i32
  }
  func.func @transform_3(%arg0: i32) -> (i32, i32) {
    %c0_i32 = arith.constant 0 : i32
    %c0_i32_0 = arith.constant 0 : i32
    %c0_i32_1 = arith.constant 0 : i32
    return %c0_i32, %c0_i32_0 : i32, i32
  }
  func.func @transform_4(%arg0: i32) -> (i32, i32) {
    %c0_i32 = arith.constant 0 : i32
    %c0_i32_0 = arith.constant 0 : i32
    %c0_i32_1 = arith.constant 0 : i32
    return %c0_i32, %c0_i32_0 : i32, i32
  }
  func.func @transform_5(%arg0: i32) -> (i32, i32) {
    %c0_i32 = arith.constant 0 : i32
    %c0_i32_0 = arith.constant 0 : i32
    %c0_i32_1 = arith.constant 0 : i32
    return %c0_i32, %c0_i32_0 : i32, i32
  }
  func.func @transform_6(%arg0: i32) -> (i32, i32) {
    %c0_i32 = arith.constant 0 : i32
    %c0_i32_0 = arith.constant 0 : i32
    %c0_i32_1 = arith.constant 0 : i32
    return %c0_i32, %c0_i32_0 : i32, i32
  }
  func.func @transform_7(%arg0: i32) -> (i32, i32) {
    %c0_i32 = arith.constant 0 : i32
    %c0_i32_0 = arith.constant 0 : i32
    return %arg0, %c0_i32 : i32, i32
  }
}

</mosaic_0001>

<bundles_post_ra>
// kernel: dqnetwork_forward.1
= control target key start
LH: loop header
LB: loop body
LE: loop exit
PB: predicated region body
PF: predicated region fallthrough
CT: control target
= control target key end

     0   :  { %12 = vsyncpa [#allocation3], 0  ;;  %s1011_s0 = inlined_call_operand.hbm [shape: f32[8,32], index: 0, kind: input, shape index: {}]   ;;  %s1012_s1 = inlined_call_operand.hbm [shape: bf16[32,256], index: 1, kind: input, shape index: {}]   ;;  %s1013_s2 = inlined_call_operand.vmem [shape: f32[1,256], index: 2, kind: input, shape index: {}]   ;;  %s1014_s3 = inlined_call_operand.hbm [shape: bf16[256,256], index: 3, kind: input, shape index: {}]   ;;  %s1015_s4 = inlined_call_operand.vmem [shape: f32[1,256], index: 4, kind: input, shape index: {}]   ;;  %s1016_s5 = inlined_call_operand.hbm [shape: bf16[256,128], index: 5, kind: input, shape index: {}]   ;;  %s1017_s6 = inlined_call_operand.vmem [shape: f32[1,8], index: 6, kind: input, shape index: {}]   ;;  %s1018_s7 = inlined_call_operand.hbm [shape: f32[8,8], index: 7, kind: output, shape index: {}]  }
   0x1   :  { %13 = vsyncpa [#allocation6], 0 }
   0x2   :  { %14 = vsyncpa [#allocation9], 0 }
   0x3   :  { %15 = vsyncpa [#allocation4], 0  ;;  %s886_s24 = smov [#allocation5]   ;;  %s768_s28 = scalar_lea.hbm %s1012_s1, 512 }
   0x4   :  { %s31_s25 = sshll.u32 %s886_s24, 4  ;;  %p769_p0 = scmp.ne.s32.totalorder %s1012_s1, %s768_s28  ;;  %s32_s25 = int_to_ptr.vmem [resolvable:$true] %s31_s25 }
   0x5   :  { %p772_p1 = scmp.lt.u32.totalorder %s768_s28, %s1012_s1 }
   0x7   :  { %p774_p2 = pnand %p772_p1, %p769_p0 }
   0x9   :  { %777 = shalt.err (!%p774_p2)
}
   0xa   :  { %s778_s10 = scalar_lea.vmem %s32_s25, 512  ;;  %p783_p4 = scmp.lt.s32.totalorder %s32_s25, %s32_s25 }
   0xb   :  { %p779_p3 = scmp.ne.s32.totalorder %s32_s25, %s778_s10  ;;  %p784_p5 = scmp.lt.s32.totalorder %s778_s10, %s778_s10 }
   0xd   :  { %p785_p6 = por %p784_p5, %p783_p4 }
   0xf   :  { %p786_p7 = pnand %p785_p6, %p779_p3 }
  0x11   :  { %789 = shalt.err (!%p786_p7)
}
  0x12   :  { %s887_s11 = smov 128   ;;  %s888_s12 = smov 8  }
  0x13   :  { %37 = dma.hbm_to_vmem [thread:$0]  %s1012_s1, 512, %s32_s25, [#allocation6], %s887_s11, %s887_s11, %s888_s12  }
  0x14   :  { %s889_s15 = smov [#allocation2]   ;;  %s890_s17 = smov [#allocation7]  }
  0x15   :  { %s22_s16 = sshll.u32 %s889_s15, 4  ;;  %s45_s18 = sshll.u32 %s890_s17, 4  ;;  %s23_s16 = int_to_ptr.vmem [resolvable:$true] %s22_s16  ;;  %s46_s18 = int_to_ptr.vmem [resolvable:$true] %s45_s18 }
  0x16   :  { %s790_s21 = scalar_lea.hbm %s1011_s0, 128 }
  0x17   :  { %p791_p8 = scmp.ne.s32.totalorder %s1011_s0, %s790_s21  ;;  %p794_p9 = scmp.lt.u32.totalorder %s790_s21, %s1011_s0 }
  0x19   :  { %p796_p10 = pnand %p794_p9, %p791_p8 }
  0x1b   :  { %799 = shalt.err (!%p796_p10)
}
  0x1c   :  { %s800_s1 = scalar_lea.vmem %s23_s16, 128  ;;  %p805_p12 = scmp.lt.s32.totalorder %s23_s16, %s23_s16 }
  0x1d   :  { %p801_p11 = scmp.ne.s32.totalorder %s23_s16, %s800_s1  ;;  %p806_p13 = scmp.lt.s32.totalorder %s800_s1, %s800_s1 }
  0x1f   :  { %p807_p0 = por %p806_p13, %p805_p12 }
  0x21   :  { %p808_p1 = pnand %p807_p0, %p801_p11 }
  0x23   :  { %811 = shalt.err (!%p808_p1)
}
  0x24   :  { %25 = dma.hbm_to_vmem [thread:$0]  %s1011_s0, 128, %s23_s16, [#allocation3]  }
  0x25   :  { %s812_s30 = scalar_lea.hbm %s1014_s3, 4096 }
  0x26   :  { %p813_p2 = scmp.ne.s32.totalorder %s1014_s3, %s812_s30  ;;  %p816_p3 = scmp.lt.u32.totalorder %s812_s30, %s1014_s3 }
  0x28   :  { %p818_p4 = pnand %p816_p3, %p813_p2 }
  0x2a   :  { %821 = shalt.err (!%p818_p4)
}
  0x2b   :  { %s822_s14 = scalar_lea.vmem %s46_s18, 4096  ;;  %p827_p6 = scmp.lt.s32.totalorder %s46_s18, %s46_s18 }
  0x2c   :  { %p823_p5 = scmp.ne.s32.totalorder %s46_s18, %s822_s14  ;;  %p828_p7 = scmp.lt.s32.totalorder %s822_s14, %s822_s14 }
  0x2e   :  { %p829_p8 = por %p828_p7, %p827_p6 }
  0x30   :  { %p830_p9 = pnand %p829_p8, %p823_p5 }
  0x32   :  { %833 = shalt.err (!%p830_p9)
}
  0x33   :  { %51 = dma.hbm_to_vmem [thread:$0]  %s1014_s3, 4096, %s46_s18, [#allocation6], %s887_s11, %s887_s11, %s888_s12  }
  0x34   :  { %s891_s16 = smov [#allocation8]   ;;  %s834_s21 = scalar_lea.hbm %s1016_s5, 2048 }
  0x35   :  { %s59_s17 = sshll.u32 %s891_s16, 4  ;;  %p835_p10 = scmp.ne.s32.totalorder %s1016_s5, %s834_s21  ;;  %s60_s17 = int_to_ptr.vmem [resolvable:$true] %s59_s17 }
  0x36   :  { %p838_p11 = scmp.lt.u32.totalorder %s834_s21, %s1016_s5 }
  0x38   :  { %p840_p12 = pnand %p838_p11, %p835_p10 }
  0x3a   :  { %843 = shalt.err (!%p840_p12)
}
  0x3b   :  { %s844_s1 = scalar_lea.vmem %s60_s17, 2048  ;;  %p849_p0 = scmp.lt.s32.totalorder %s60_s17, %s60_s17 }
  0x3c   :  { %p845_p13 = scmp.ne.s32.totalorder %s60_s17, %s844_s1  ;;  %p850_p1 = scmp.lt.s32.totalorder %s844_s1, %s844_s1 }
  0x3e   :  { %p851_p2 = por %p850_p1, %p849_p0 }
  0x40   :  { %p852_p3 = pnand %p851_p2, %p845_p13 }
  0x42   :  { %855 = shalt.err (!%p852_p3)
}
  0x43   :  { %s892_s3 = smov 64   ;;  %s893_s11 = smov 4  }
  0x44   :  { %65 = dma.hbm_to_vmem [thread:$0]  %s1016_s5, 2048, %s60_s17, [#allocation9], %s892_s3, %s892_s3, %s893_s11  }
  0x45   :  { %878 = dma.done.wait [#allocation3], 128  }
  0x46   :  { %879 = vsyncadd [#allocation3], 4294967168 }
  0x47   :  { %880 = dma.done.wait [#allocation6], 4608  }
  0x48   :  { %881 = vsyncadd [#allocation6], 4294962688 }
  0x49   :  { %882 = dma.done.wait [#allocation9], 2048  }
  0x4a   :  { %883 = vsyncadd [#allocation9], 4294965248  ;;  %v894_v0 = vmov 0   ;;  %v698_v1 = vld [vmem:[#allocation5 + $0x4] ss:$8 sps:$4 sm:$0xff]   ;;  %v81_v5 = vld [vmem:[#allocation2] sm:$0xff]  ;;  %v89_v51 = vlaneseq }
  0x4b   :  { %155 = vmatprep.mubr.bf16.mxu0 %v894_v0  ;;  %v700_v2 = vld [vmem:[#allocation5] ss:$8 sps:$4 sm:$0xff]   ;;  %123 = vmatprep.subr.bf16.mxu0 %v698_v1  ;;  %v701_v3 = vld [vmem:[#allocation5 + $0x14] ss:$8 sps:$4 sm:$0xff]   ;;  %v703_v4 = vld [vmem:[#allocation5 + $0x10] ss:$8 sps:$4 sm:$0xff]   ;;  %v82_v9 = vpack.c.bf16 %v81_v5, %v81_v5 }
  0x4c   :  { %124 = vmatpush1.bf16.msra.mxu0 %v700_v2  ;;  %v704_v6 = vld [vmem:[#allocation7 + $0x4] ss:$8 sps:$4 sm:$0xff]   ;;  %v706_v7 = vld [vmem:[#allocation7] ss:$8 sps:$4 sm:$0xff]   ;;  %v707_v8 = vld [vmem:[#allocation7 + $0x14] ss:$8 sps:$4 sm:$0xff]  }
  0x4d   :  { %125 = vmatprep.subr.bf16.mxu0 %v701_v3  ;;  %372 = vmatprep.subr.bf16.mxu1 %v704_v6  ;;  %v709_v10 = vld [vmem:[#allocation7 + $0x10] ss:$8 sps:$4 sm:$0xff]   ;;  %vm119_vm0 = vcmask 261120   ;;  %v710_v11 = vld [vmem:[#allocation7 + $0x24] ss:$8 sps:$4 sm:$0xff]   ;;  %v90_v52 = vshrl.u32 %v89_v51, 7 }
  0x4e   :  { %373 = vmatpush1.bf16.msra.mxu1 %v706_v7  ;;  %v712_v12 = vld [vmem:[#allocation7 + $0x20] ss:$8 sps:$4 sm:$0xff]   ;;  %v713_v13 = vld [vmem:[#allocation7 + $0x34] ss:$8 sps:$4 sm:$0xff]   ;;  %v715_v14 = vld [vmem:[#allocation7 + $0x30] ss:$8 sps:$4 sm:$0xff]  }
  0x4f   :  { %374 = vmatprep.subr.bf16.mxu1 %v707_v8  ;;  %v716_v15 = vld [vmem:[#allocation7 + $0x44] ss:$8 sps:$4 sm:$0xff]   ;;  %v718_v16 = vld [vmem:[#allocation7 + $0x40] ss:$8 sps:$4 sm:$0xff]   ;;  %v719_v17 = vld [vmem:[#allocation7 + $0x54] ss:$8 sps:$4 sm:$0xff]  }
  0x50   :  { %126 = vmatpush1.bf16.msra.mxu0 %v703_v4  ;;  %v721_v18 = vld [vmem:[#allocation7 + $0x50] ss:$8 sps:$4 sm:$0xff]   ;;  %v722_v19 = vld [vmem:[#allocation7 + $0x64] ss:$8 sps:$4 sm:$0xff]   ;;  %v724_v20 = vld [vmem:[#allocation7 + $0x60] ss:$8 sps:$4 sm:$0xff]  }
  0x51   :  { %v725_v21 = vld [vmem:[#allocation7 + $0x74] ss:$8 sps:$4 sm:$0xff]   ;;  %v727_v22 = vld [vmem:[#allocation7 + $0x70] ss:$8 sps:$4 sm:$0xff]   ;;  %v728_v23 = vld [vmem:[#allocation7 + $0x84] ss:$8 sps:$4 sm:$0xff]  }
  0x52   :  { %375 = vmatpush1.bf16.msra.mxu1 %v709_v10  ;;  %v730_v24 = vld [vmem:[#allocation7 + $0x80] ss:$8 sps:$4 sm:$0xff]   ;;  %v731_v25 = vld [vmem:[#allocation7 + $0x94] ss:$8 sps:$4 sm:$0xff]   ;;  %v733_v26 = vld [vmem:[#allocation7 + $0x90] ss:$8 sps:$4 sm:$0xff]  }
  0x53   :  { %616 = vmatmul.mubr.msk.bf16.vlgmr.msra.gmra.mrb[0].mxu0 %vm119_vm0, %v82_v9  ;;  %376 = vmatprep.subr.bf16.mxu1 %v710_v11  ;;  %v734_v27 = vld [vmem:[#allocation7 + $0xa4] ss:$8 sps:$4 sm:$0xff]   ;;  %v736_v28 = vld [vmem:[#allocation7 + $0xa0] ss:$8 sps:$4 sm:$0xff]   ;;  %v737_v29 = vld [vmem:[#allocation7 + $0xb4] ss:$8 sps:$4 sm:$0xff]  }
  0x54   :  { %v739_v30 = vld [vmem:[#allocation7 + $0xb0] ss:$8 sps:$4 sm:$0xff]   ;;  %v740_v31 = vld [vmem:[#allocation7 + $0xc4] ss:$8 sps:$4 sm:$0xff]   ;;  %v742_v32 = vld [vmem:[#allocation7 + $0xc0] ss:$8 sps:$4 sm:$0xff]  }
  0x55   :  { %v743_v33 = vld [vmem:[#allocation7 + $0xd4] ss:$8 sps:$4 sm:$0xff]   ;;  %v745_v34 = vld [vmem:[#allocation7 + $0xd0] ss:$8 sps:$4 sm:$0xff]   ;;  %v746_v35 = vld [vmem:[#allocation7 + $0xe4] ss:$8 sps:$4 sm:$0xff]  }
  0x56   :  { %377 = vmatpush1.bf16.msra.mxu1 %v712_v12  ;;  %v748_v36 = vld [vmem:[#allocation7 + $0xe0] ss:$8 sps:$4 sm:$0xff]   ;;  %v749_v37 = vld [vmem:[#allocation7 + $0xf4] ss:$8 sps:$4 sm:$0xff]   ;;  %v751_v38 = vld [vmem:[#allocation7 + $0xf0] ss:$8 sps:$4 sm:$0xff]  }
  0x57   :  { %378 = vmatprep.subr.bf16.mxu1 %v713_v13  ;;  %v752_v39 = vld [vmem:[#allocation8 + $0x40] sm:$0xff]   ;;  %v754_v41 = vld [vmem:[#allocation8 + $0x48] sm:$0xff]   ;;  %v756_v43 = vld [vmem:[#allocation8 + $0x50] sm:$0xff]   ;;  %v91_v53 = vsub.s32 0, %v90_v52  ;;  %v95_v55 = vsub.s32 1, %v90_v52  ;;  %vm593_vm1 = vcmask 64512  }
  0x58   :  { %v753_v40 = vld [vmem:[#allocation8] sm:$0xff]   ;;  %666 = vmatprep.subr.bf16.mxu0 %v752_v39  ;;  %v755_v42 = vld [vmem:[#allocation8 + $0x8] sm:$0xff]   ;;  %v757_v44 = vld [vmem:[#allocation8 + $0x10] sm:$0xff]  }
  0x59   :  { %667 = vmatpush3.bf16.msra.mxu0 %v753_v40  ;;  %v758_v45 = vld [vmem:[#allocation8 + $0x58] sm:$0xff]   ;;  %v760_v47 = vld [vmem:[#allocation8 + $0x60] sm:$0xff]   ;;  %v762_v49 = vld [vmem:[#allocation8 + $0x68] sm:$0xff]  }
  0x5a   :  { %379 = vmatpush1.bf16.msra.mxu1 %v715_v14  ;;  %668 = vmatprep.subr.bf16.mxu0 %v754_v41  ;;  %v759_v46 = vld [vmem:[#allocation8 + $0x18] sm:$0xff]   ;;  %v761_v48 = vld [vmem:[#allocation8 + $0x20] sm:$0xff]   ;;  %v763_v50 = vld [vmem:[#allocation8 + $0x28] sm:$0xff]  }
  0x5b   :  { %380 = vmatprep.subr.bf16.mxu1 %v716_v15  ;;  %v87_v54 = vld [vmem:[%s1013_s2] sm:$0x3]  ;;  %v764_v4 = vld [vmem:[#allocation8 + $0x70] sm:$0xff]  }
  0x5c   :  { %v92_v56 = vrot.slane %v87_v54, %v91_v53  ;;  %v96_v57 = vrot.slane %v87_v54, %v95_v55  ;;  %v765_v5 = vld [vmem:[#allocation8 + $0x30] sm:$0xff]   ;;  %v766_v6 = vld [vmem:[#allocation8 + $0x78] sm:$0xff]  }
  0x5d   :  { %669 = vmatpush3.bf16.msra.mxu0 %v755_v42  ;;  %v767_v7 = vld [vmem:[#allocation8 + $0x38] sm:$0xff]  }
  0x5e   :  { %381 = vmatpush1.bf16.msra.mxu1 %v718_v16  ;;  %670 = vmatprep.subr.bf16.mxu0 %v756_v43  ;;  %v200_v8 = vld [vmem:[%s1015_s4] sm:$0x3]  ;;  %s895_s4 = smov [#allocation10]  }
  0x5f   :  { %382 = vmatprep.subr.bf16.mxu1 %v719_v17  ;;  %v205_v9 = vrot.slane %v200_v8, %v91_v53  ;;  %v209_v10 = vrot.slane %v200_v8, %v95_v55  ;;  %s601_s30 = sshll.u32 %s895_s4, 4  ;;  %s602_s30 = int_to_ptr.vmem [resolvable:$true] %s601_s30 }
  0x60   :  { %s856_s8 = scalar_lea.vmem %s602_s30, 128  ;;  %p861_p5 = scmp.lt.s32.totalorder %s602_s30, %s602_s30 }
  0x61   :  { %671 = vmatpush3.bf16.msra.mxu0 %v757_v44  ;;  %p857_p4 = scmp.ne.s32.totalorder %s602_s30, %s856_s8  ;;  %p862_p6 = scmp.lt.s32.totalorder %s856_s8, %s856_s8 }
  0x62   :  { %383 = vmatpush1.bf16.msra.mxu1 %v721_v18  ;;  %672 = vmatprep.subr.bf16.mxu0 %v758_v45 }
  0x63   :  { %384 = vmatprep.subr.bf16.mxu1 %v722_v19  ;;  %p863_p7 = por %p862_p6, %p861_p5 }
  0x65   :  { %673 = vmatpush3.bf16.msra.mxu0 %v759_v46  ;;  %p864_p8 = pnand %p863_p7, %p857_p4 }
  0x66   :  { %385 = vmatpush1.bf16.msra.mxu1 %v724_v20  ;;  %674 = vmatprep.subr.bf16.mxu0 %v760_v47 }
  0x67   :  { %386 = vmatprep.subr.bf16.mxu1 %v725_v21 }
  0x69   :  { %675 = vmatpush3.bf16.msra.mxu0 %v761_v48 }
  0x6a   :  { %387 = vmatpush1.bf16.msra.mxu1 %v727_v22  ;;  %676 = vmatprep.subr.bf16.mxu0 %v762_v49 }
  0x6b   :  { %388 = vmatprep.subr.bf16.mxu1 %v728_v23  ;;  %v665_v23 = vld [vmem:[%s1017_s6] ss:$0 sm:$0xff] }
  0x6d   :  { %677 = vmatpush3.bf16.msra.mxu0 %v763_v50 }
  0x6e   :  { %389 = vmatpush1.bf16.msra.mxu1 %v730_v24  ;;  %678 = vmatprep.subr.bf16.mxu0 %v764_v4 }
  0x6f   :  { %390 = vmatprep.subr.bf16.mxu1 %v731_v25 }
  0x71   :  { %679 = vmatpush3.bf16.msra.mxu0 %v765_v5 }
  0x72   :  { %391 = vmatpush1.bf16.msra.mxu1 %v733_v26  ;;  %680 = vmatprep.subr.bf16.mxu0 %v766_v6 }
  0x73   :  { %392 = vmatprep.subr.bf16.mxu1 %v734_v27 }
  0x75   :  { %681 = vmatpush3.bf16.msra.mxu0 %v767_v7 }
  0x76   :  { %393 = vmatpush1.bf16.msra.mxu1 %v736_v28 }
  0x77   :  { %394 = vmatprep.subr.bf16.mxu1 %v737_v29 }
  0x7a   :  { %395 = vmatpush1.bf16.msra.mxu1 %v739_v30 }
  0x7b   :  { %396 = vmatprep.subr.bf16.mxu1 %v740_v31 }
  0x7e   :  { %397 = vmatpush1.bf16.msra.mxu1 %v742_v32 }
  0x7f   :  { %398 = vmatprep.subr.bf16.mxu1 %v743_v33 }
  0x82   :  { %399 = vmatpush1.bf16.msra.mxu1 %v745_v34 }
  0x83   :  { %400 = vmatprep.subr.bf16.mxu1 %v746_v35 }
  0x86   :  { %401 = vmatpush1.bf16.msra.mxu1 %v748_v36 }
  0x87   :  { %402 = vmatprep.subr.bf16.mxu1 %v749_v37 }
  0x8a   :  { %403 = vmatpush1.bf16.msra.mxu1 %v751_v38 }
 0x126   :  { %v157_v58 = vpop.f32.mrb[0].mxu0 }
 0x127   :  { %v158_v59 = vadd.f32 %v157_v58, %v92_v56  ;;  %v159_v60 = vpop.f32.mrb[1].mxu0 }
 0x128   :  { %v160_v61 = vadd.f32 %v159_v60, %v96_v57  ;;  %v161_v62 = vpop.f32.mrb[2].mxu0 }
 0x129   :  { %v164_v63 = vmax.f32 %v158_v59, 0.0  ;;  %v162_v0 = vpop.f32.mrb[3].mxu0 }
 0x12a   :  { %v165_v1 = vmax.f32 %v160_v61, 0.0 }
 0x12b   :  { %v166_v3 = vpack.c.bf16 %v164_v63, %v164_v63 }
 0x12c   :  { %v167_v2 = vpack.c.bf16 %v165_v1, %v165_v1 }
 0x12e   :  { %404 = vmatprep.mubr.bf16.mxu1 %v167_v2 }
 0x12f   :  { %405 = vmatmul.mubr.bf16.vlgmr.msra.gmra.mrb[0].mxu1 %v166_v3 }
 0x202   :  { %v406_v11 = vpop.f32.mrb[0].mxu1 }
 0x203   :  { %v407_v12 = vadd.f32 %v406_v11, %v205_v9  ;;  %v408_v13 = vpop.f32.mrb[1].mxu1 }
 0x204   :  { %v409_v14 = vadd.f32 %v408_v13, %v209_v10  ;;  %v410_v15 = vpop.f32.mrb[2].mxu1 }
 0x205   :  { %v413_v16 = vmax.f32 %v407_v12, 0.0  ;;  %v411_v17 = vpop.f32.mrb[3].mxu1 }
 0x206   :  { %v414_v18 = vmax.f32 %v409_v14, 0.0 }
 0x207   :  { %v415_v20 = vpack.c.bf16 %v413_v16, %v413_v16 }
 0x208   :  { %v416_v19 = vpack.c.bf16 %v414_v18, %v414_v18 }
 0x20a   :  { %577 = vmatprep.mubr.bf16.mxu0 %v416_v19 }
 0x20b   :  { %578 = vmatmul.mubr.bf16.vlgmr.msra.gmra.mrb[4].mxu0 %v415_v20 }
 0x2de   :  { %v682_v21 = vpop.f32.mrb[4].mxu0 }
 0x2df   :  { %v683_v22 = vpop.f32.mrb[5].mxu0 }
 0x2e0   :  { %v684_v24 = vadd.f32 %v683_v22, %v682_v21  ;;  %v685_v25 = vpop.f32.mrb[6].mxu0 }
 0x2e1   :  { %v686_v26 = vpop.f32.mrb[7].mxu0 }
 0x2e2   :  { %v592_v27 = vadd.f32 %v684_v24, %v665_v23 }
 0x2e4   :  { %594 = vst.msk [vmem:[#allocation10] sm:$0xff] %vm593_vm1, %v592_v27 }
 0x2e5   :  { %867 = shalt.err (!%p864_p8)
}
 0x2e6   :  { %s868_s6 = scalar_lea.hbm %s1018_s7, 128 }
 0x2e7   :  { %p869_p9 = scmp.ne.s32.totalorder %s1018_s7, %s868_s6  ;;  %p872_p10 = scmp.lt.u32.totalorder %s868_s6, %s1018_s7 }
 0x2e9   :  { %p874_p11 = pnand %p872_p10, %p869_p9 }
 0x2eb   :  { %877 = shalt.err (!%p874_p11)
}
 0x2ec   :  { %604 = dma.vmem_to_hbm [thread:$0]  %s602_s30, 128, %s1018_s7, [#allocation4]  }
 0x2ed   :  { %884 = dma.done.wait [#allocation4], 128  }
 0x2ee   :  { %885 = vsyncadd [#allocation4], 4294967168 }
 0x2ef   :  { %608 = vsyncpa [#allocation3], 1 }
 0x2f0   :  { %609 = vsyncpa [#allocation6], 1 }
 0x2f1   :  { %610 = vsyncpa [#allocation9], 1 }
 0x2f2   :  { %611 = vsyncpa [#allocation4], 1 }

</bundles_post_ra>
